<compile_context>
chip_gen: v6e
topology: v6e:2x2x1
jax: 0.10.0
libtpu: 0.0.40
codegen_flags: <defaults>
</compile_context>

<pallas_src>
import math

import jax
import jax.numpy as jnp
from jax.experimental import pallas as pl
from jax.experimental.pallas import tpu as pltpu

LANES = 128


def _round_up(x, m):
    return (x + m - 1) // m * m


def _vmem_limit(block_bytes_total):
    # ~triple-buffer headroom + slack, clamped below v7x's 64 MiB/TC physical VMEM.
    need = 3 * block_bytes_total + (2 << 20)
    return int(min(max(need, 16 << 20), 48 << 20))


# ---------------------------------------------------------------------------
# Pallas kernels
# ---------------------------------------------------------------------------

def _xw_kernel(x_ref, w_ref, h_ref):
    """H[r, node_tile] = X[node_tile] @ W[r]; f32 accumulate, bf16 store.

    Grid = (node_tiles, R) with R innermost: the X tile block index is constant
    over R, so X stays resident and only the small W[r] is re-DMA'd.
    """
    acc = jnp.dot(x_ref[...], w_ref[0], preferred_element_type=jnp.float32)
    h_ref[0] = acc.astype(h_ref.dtype)


def _agg_kernel(h_ref, a_ref, invdeg_ref, o_ref):
    """out[dst_tile] = (sum_{r,k} A_r[dst_tile, k_tile] @ H_r[k_tile]) * inv_deg.

    Grid = (dst_tiles, R, k_tiles); both reduction axes are 'arbitrary' and the
    output block index is constant over them, so o_ref stays resident and is
    used directly as the f32 accumulator (bf16 x bf16 MXU matmul).
    """
    r = pl.program_id(1)
    k = pl.program_id(2)

    @pl.when((r == 0) & (k == 0))
    def _():
        o_ref[...] = jnp.zeros_like(o_ref)

    o_ref[...] += jnp.dot(a_ref[0], h_ref[0], preferred_element_type=jnp.float32)

    is_last = ((r == pl.num_programs(1) - 1) & (k == pl.num_programs(2) - 1))

    @pl.when(is_last)
    def _():
        o_ref[...] = o_ref[...] * invdeg_ref[...]          # fused deg-divide


def _agg_history_kernel(h_ref, a_ref, invdeg_ref, hmap_ref, hist_ref, o_ref):
    """Same as _agg_kernel, plus fused same-row history-buffer override."""
    r = pl.program_id(1)
    k = pl.program_id(2)

    @pl.when((r == 0) & (k == 0))
    def _():
        o_ref[...] = jnp.zeros_like(o_ref)

    o_ref[...] += jnp.dot(a_ref[0], h_ref[0], preferred_element_type=jnp.float32)

    is_last = ((r == pl.num_programs(1) - 1) & (k == pl.num_programs(2) - 1))

    @pl.when(is_last)
    def _():
        out = o_ref[...] * invdeg_ref[...]
        keep_hist = hmap_ref[...] != -1                    # (tm, 1) bool
        o_ref[...] = jnp.where(keep_hist, hist_ref[...], out)


# ---------------------------------------------------------------------------
# pallas_call wrappers
# ---------------------------------------------------------------------------

def relation_transform(x, w, *, tn):
    """x: [Np, Cp] f32, w: [R, Cp, Hp] f32  ->  H: [R, Np, Hp] bf16."""
    Np, Cp = x.shape
    R, _, Hp = w.shape
    grid = (Np // tn, R)
    block_bytes = tn * Cp * 4 + Cp * Hp * 4 + tn * Hp * 2
    return pl.pallas_call(
        _xw_kernel,
        out_shape=jax.ShapeDtypeStruct((R, Np, Hp), jnp.bfloat16),
        grid_spec=pltpu.PrefetchScalarGridSpec(
            num_scalar_prefetch=0,
            grid=grid,
            in_specs=[
                pl.BlockSpec((tn, Cp), lambda i, r: (i, 0)),      # X tile (resident over R)
                pl.BlockSpec((1, Cp, Hp), lambda i, r: (r, 0, 0)),  # W[r]
            ],
            out_specs=pl.BlockSpec((1, tn, Hp), lambda i, r: (r, i, 0)),
        ),
        compiler_params=pltpu.CompilerParams(
            dimension_semantics=("parallel", "arbitrary"),
            vmem_limit_bytes=_vmem_limit(block_bytes)),
        cost_estimate=pl.CostEstimate(
            flops=2 * R * Np * Cp * Hp,
            transcendentals=0,
            bytes_accessed=(4 * Np * Cp                         # X read once per node tile
                            + 4 * (Np // tn) * R * Cp * Hp      # W re-streamed per node tile
                            + 2 * R * Np * Hp)),                # bf16 H write
    )(x, w)


def rgcn_aggregate(h, a, inv_deg, hmap=None, hist=None, *, tm, tk):
    """h: [R, Np, Hp] bf16, a: [R, Np, Np] bf16, inv_deg: [Np, 1] f32 -> [Np, Hp] f32."""
    R, Np, Hp = h.shape
    grid = (Np // tm, R, Np // tk)
    with_history = hmap is not None

    in_specs = [
        pl.BlockSpec((1, tk, Hp), lambda i, r, k: (r, k, 0)),    # H_r k-tile (bf16)
        pl.BlockSpec((1, tm, tk), lambda i, r, k: (r, i, k)),    # A_r dst x src tile (bf16)
        pl.BlockSpec((tm, 1), lambda i, r, k: (i, 0)),           # inv_deg tile (resident)
    ]
    args = [h, a, inv_deg]
    kernel = _agg_kernel
    block_bytes = tk * Hp * 2 + tm * tk * 2 + tm * 4 + tm * Hp * 4
    extra_hbm = 0
    if with_history:
        in_specs += [
            pl.BlockSpec((tm, 1), lambda i, r, k: (i, 0)),       # history_map tile
            pl.BlockSpec((tm, Hp), lambda i, r, k: (i, 0)),      # history_buffer tile
        ]
        args += [hmap, hist]
        kernel = _agg_history_kernel
        block_bytes += tm * 4 + tm * Hp * 4
        extra_hbm = Np * 4 + Np * Hp * 4

    a_bytes = jnp.dtype(a.dtype).itemsize
    h_bytes = jnp.dtype(h.dtype).itemsize
    return pl.pallas_call(
        kernel,
        out_shape=jax.ShapeDtypeStruct((Np, Hp), jnp.float32),
        grid_spec=pltpu.PrefetchScalarGridSpec(
            num_scalar_prefetch=0,
            grid=grid,
            in_specs=in_specs,
            out_specs=pl.BlockSpec((tm, Hp), lambda i, r, k: (i, 0)),
        ),
        compiler_params=pltpu.CompilerParams(
            dimension_semantics=("parallel", "arbitrary", "arbitrary"),
            vmem_limit_bytes=_vmem_limit(block_bytes)),
        cost_estimate=pl.CostEstimate(
            flops=2 * R * Np * Np * Hp,
            transcendentals=0,
            bytes_accessed=(R * Np * Np * a_bytes                       # A streamed once
                            + (Np // tm) * R * Np * Hp * h_bytes        # H re-streamed per dst tile
                            + Np * Hp * 4 + Np * 4                      # out write + inv_deg
                            + extra_hbm)),
    )(*args)


# ---------------------------------------------------------------------------
# Glue: graph densification + module forward
# ---------------------------------------------------------------------------

def glorot_rel_weight(key, num_rel, c_in, c_out):
    # torch_geometric glorot on (R, in, out): uniform(-a, a), a = sqrt(6/(in+out))
    a = jnp.sqrt(6.0 / (c_in + c_out))
    return jax.random.uniform(key, (num_rel, c_in, c_out),
                              jnp.float32, minval=-a, maxval=a)


def build_dense_relational_graph(ptr, idx, edge_types, num_rel, num_node, num_node_padded):
    """CSR (ptr, idx, edge_types) -> per-relation bf16 adjacency (padded) + 1/deg.

    A is built directly in bf16 at the padded size: edge-multiplicity counts are
    exact in bf16 for < 256 parallel edges, and no f32 transient is materialized.
    Built once per graph and reusable across calls/layers.
    """
    num_edge = idx.shape[0]
    deg = (ptr[1:num_node + 1] - ptr[:num_node]).astype(jnp.int32)       # [N]
    dst = jnp.repeat(jnp.arange(num_node, dtype=jnp.int32), deg,
                     total_repeat_length=num_edge)                       # [E]
    A = jnp.zeros((num_rel, num_node_padded, num_node_padded), jnp.bfloat16)
    A = A.at[edge_types, dst, idx].add(jnp.ones((num_edge,), jnp.bfloat16))
    # deg==0 rows have zero accumulated messages; clamp avoids 0/0 -> NaN.
    # (Semantic deviation from PyTorch, which would produce NaN/Inf for isolated nodes.)
    inv_deg = 1.0 / jnp.maximum(deg, 1).astype(jnp.float32)
    inv_deg_p = jnp.ones((num_node_padded, 1), jnp.float32).at[:num_node, 0].set(inv_deg)
    return A, inv_deg_p


def my_rgcn_conv_history_forward(x, ptr, idx, edge_types, count, history_map,
                                 history_buffer, used_mask, history_size,
                                 num_node, rel_weight, *, tm=256, tk=256):
    """Pallas equivalent of MyRGCNConvHistory.forward; returns (out, his)."""
    del count, used_mask           # not used on the inference numeric path
    N = int(num_node)
    C = x.shape[1]
    R, _, H = rel_weight.shape

    # ---- MXU/lane-aligned tiling & padding ----
    tm_eff = _round_up(min(tm, max(N, 1)), LANES)                 # multiple of 128
    tk_eff = _round_up(min(tk, max(N, 1)), LANES)                 # multiple of 128
    Np = _round_up(N, math.lcm(tm_eff, tk_eff))                   # multiple of 128
    Cp = _round_up(C, LANES)
    # v6e/v7x MXUs are 2x 256x256: pad hidden to 256 columns when it exceeds 128.
    Hp = _round_up(H, 256) if H > LANES else _round_up(H, LANES)

    A, inv_deg = build_dense_relational_graph(ptr, idx, edge_types, R, N, Np)

    x_p = jnp.zeros((Np, Cp), jnp.float32).at[:N, :C].set(x.astype(jnp.float32))
    w_p = jnp.zeros((R, Cp, Hp), jnp.float32).at[:, :C, :H].set(
        rel_weight.astype(jnp.float32))

    hmap_p = None
    hist_p = None
    if history_size > 0:
        hmap_p = jnp.full((Np, 1), -1, jnp.int32).at[:N, 0].set(
            history_map.astype(jnp.int32))
        hist_p = jnp.zeros((Np, Hp), jnp.float32).at[:N, :H].set(
            history_buffer.astype(jnp.float32))

    h = relation_transform(x_p, w_p, tn=tm_eff)                        # [R, Np, Hp] bf16
    out_p = rgcn_aggregate(h, A, inv_deg, hmap_p, hist_p, tm=tm_eff, tk=tk_eff)
    out = out_p[:N, :H]
    return out, out                 # his aliases out (retain_grad is a no-op here)


# ---------------------------------------------------------------------------
# Pure-JAX reference (edge-wise scatter-add) for correctness checking
# ---------------------------------------------------------------------------

def ref_forward(x, ptr, idx, edge_types, rel_weight, num_node,
                history_map, history_buffer, history_size):
    deg = (ptr[1:num_node + 1] - ptr[:num_node]).astype(jnp.int32)
    dst = jnp.repeat(jnp.arange(num_node, dtype=jnp.int32), deg,
                     total_repeat_length=idx.shape[0])
    msg = jnp.einsum('ec,ech->eh', x[idx], rel_weight[edge_types])
    out = jnp.zeros((num_node, rel_weight.shape[-1]), jnp.float32).at[dst].add(msg)
    out = out / jnp.maximum(deg, 1).astype(jnp.float32)[:, None]
    if history_size > 0:
        out = jnp.where((history_map != -1)[:, None], history_buffer, out)
    return out


# ---------------------------------------------------------------------------
# Main
# ---------------------------------------------------------------------------

if __name__ == "__main__":
    num_node = 16
    in_channels = 32
    hidden_channels = 32
    num_rel = 4
    deg_per_node = 6
    num_edge = num_node * deg_per_node

    key = jax.random.PRNGKey(0)
    k_idx, k_rel, k_x, k_w, k_hb = jax.random.split(key, 5)

    # CSR graph: every node has deg_per_node incoming edges.
    ptr = jnp.arange(num_node + 1, dtype=jnp.int32) * deg_per_node
    idx = jax.random.randint(k_idx, (num_edge,), 0, num_node, jnp.int32)
    edge_types = jax.random.randint(k_rel, (num_edge,), 0, num_rel, jnp.int32)
    x = jax.random.normal(k_x, (num_node, in_channels), jnp.float32)
    rel_weight = glorot_rel_weight(k_w, num_rel, in_channels, hidden_channels)

    count = jnp.zeros((num_edge,), jnp.int32)      # unused by the forward numerics
    used_mask = jnp.ones((num_rel,), jnp.bool_)    # unused by the forward numerics

    # --- path 1: history_size == 0 ---
    hm_none = jnp.full((num_node,), -1, jnp.int32)
    hb_none = jnp.zeros((num_node, hidden_channels), jnp.float32)
    out0, his0 = my_rgcn_conv_history_forward(
        x, ptr, idx, edge_types, count, hm_none, hb_none, used_mask,
        history_size=0, num_node=num_node, rel_weight=rel_weight)
    out0 = jax.block_until_ready(out0)
    ref0 = ref_forward(x, ptr, idx, edge_types, rel_weight, num_node,
                       hm_none, hb_none, 0)
    assert out0.shape == (num_node, hidden_channels)
    assert bool(jnp.all(jnp.isfinite(out0)))
    assert bool(jnp.allclose(out0, ref0, atol=5e-2, rtol=5e-2))
    assert bool(jnp.array_equal(out0, his0))

    # --- path 2: history_size > 0 (cached rows override the computed output) ---
    history_map = jnp.where(jnp.arange(num_node) % 3 == 0,
                            jnp.arange(num_node), -1).astype(jnp.int32)
    history_buffer = jax.random.normal(k_hb, (num_node, hidden_channels), jnp.float32)
    out1, his1 = my_rgcn_conv_history_forward(
        x, ptr, idx, edge_types, count, history_map, history_buffer, used_mask,
        history_size=4, num_node=num_node, rel_weight=rel_weight)
    out1 = jax.block_until_ready(out1)
    ref1 = ref_forward(x, ptr, idx, edge_types, rel_weight, num_node,
                       history_map, history_buffer, 4)
    assert bool(jnp.allclose(out1, ref1, atol=5e-2, rtol=5e-2))
    sel = history_map != -1
    assert bool(jnp.allclose(out1[sel], history_buffer[sel]))
    assert bool(jnp.array_equal(out1, his1))

    print("KERNEL_OK")
</pallas_src>

<mosaic_0001>
module attributes {stable_mosaic.version = 11 : i64} {
  func.func @_xw_kernel(%arg0: i32, %arg1: i32, %arg2: memref<128x128xf32, #tpu.memory_space<vmem>>, %arg3: memref<1x128x128xf32, #tpu.memory_space<vmem>>, %arg4: memref<1x128x128xbf16, #tpu.memory_space<vmem>>) attributes {dimension_semantics = [#tpu.dimension_semantics<parallel>, #tpu.dimension_semantics<arbitrary>], iteration_bounds = array<i64: 1, 4>, scalar_prefetch = 0 : i64, scratch_operands = 0 : i64, tpu.core_type = #tpu.core_type<tc>, window_params = [{transform_indices = @transform_0, window_bounds = array<i64: 128, 128>}, {transform_indices = @transform_1, window_bounds = array<i64: 1, 128, 128>}, {transform_indices = @transform_2, window_bounds = array<i64: 1, 128, 128>}]} {
    %c0 = arith.constant 0 : index
    %c0_0 = arith.constant 0 : index
    %0 = vector.load %arg2[%c0, %c0_0] : memref<128x128xf32, #tpu.memory_space<vmem>>, vector<128x128xf32>
    %c0_1 = arith.constant 0 : index
    %c0_2 = arith.constant 0 : index
    %c0_3 = arith.constant 0 : index
    %1 = vector.load %arg3[%c0_1, %c0_2, %c0_3] : memref<1x128x128xf32, #tpu.memory_space<vmem>>, vector<1x128x128xf32>
    %2 = vector.shape_cast %1 : vector<1x128x128xf32> to vector<128x128xf32>
    %cst = arith.constant dense<0.000000e+00> : vector<128x128xf32>
    %3 = tpu.matmul %0, %2, %cst {dimension_numbers = #tpu.dot_dimension_numbers<[1], [0], [0], [1], [0, 0, 1, 1], [], []>} : vector<128x128xf32>, vector<128x128xf32>, vector<128x128xf32> -> vector<128x128xf32>
    %4 = arith.truncf %3 : vector<128x128xf32> to vector<128x128xbf16>
    %c0_4 = arith.constant 0 : index
    %c0_5 = arith.constant 0 : index
    %c0_6 = arith.constant 0 : index
    %5 = vector.load %arg4[%c0_4, %c0_5, %c0_6] : memref<1x128x128xbf16, #tpu.memory_space<vmem>>, vector<1x128x128xbf16>
    %6 = vector.shape_cast %5 : vector<1x128x128xbf16> to vector<128x128xbf16>
    %7 = vector.shape_cast %4 : vector<128x128xbf16> to vector<1x128x128xbf16>
    tpu.vector_store %arg4[%c0_4, %c0_5, %c0_6], %7 {strides = array<i32>} : memref<1x128x128xbf16, #tpu.memory_space<vmem>>, vector<1x128x128xbf16>,
    return
  }
  func.func @transform_0(%arg0: i32, %arg1: i32) -> (i32, i32) {
    %c0_i32 = arith.constant 0 : i32
    %c0_i32_0 = arith.constant 0 : i32
    return %arg0, %c0_i32 : i32, i32
  }
  func.func @transform_1(%arg0: i32, %arg1: i32) -> (i32, i32, i32) {
    %c0_i32 = arith.constant 0 : i32
    %c0_i32_0 = arith.constant 0 : i32
    %c0_i32_1 = arith.constant 0 : i32
    return %arg1, %c0_i32, %c0_i32_0 : i32, i32, i32
  }
  func.func @transform_2(%arg0: i32, %arg1: i32) -> (i32, i32, i32) {
    %c0_i32 = arith.constant 0 : i32
    %c0_i32_0 = arith.constant 0 : i32
    return %arg1, %arg0, %c0_i32 : i32, i32, i32
  }
}

</mosaic_0001>

<bundles_post_ra>
// kernel: tpu_custom_call.1
= control target key start
LH: loop header
LB: loop body
LE: loop exit
PB: predicated region body
PF: predicated region fallthrough
CT: control target
= control target key end

     0   :  { %7 = vsyncpa [#allocation3], 0  ;;  %s1233_s0 = inlined_call_operand.hbm [shape: f32[128,128], index: 0, kind: input, shape index: {}]   ;;  %s1234_s1 = inlined_call_operand.hbm [shape: f32[4,128,128], index: 1, kind: input, shape index: {}]   ;;  %s1235_s2 = inlined_call_operand.hbm [shape: bf16[4,128,128], index: 2, kind: output, shape index: {}]  }
   0x1   :  { %8 = vsyncpa [#allocation6], 0 }
   0x2   :  { %10 = vsyncpa [#allocation6 + $0x1], 0 }
   0x3   :  { %11 = vsyncpa [#allocation4], 0 }
   0x4   :  { %13 = vsyncpa [#allocation4 + $0x1], 0  ;;  %s1029_s9 = smov 0   ;;  %s1031_s10 = smov 0  }
   0x5   :  { %s1033_s11 = smov 0   ;;  %s1035_s12 = smov 0  }
   0x6   :  { %s1037_s13 = smov 0   ;;  %s1039_s14 = smov 0  }
   0x7 LB: > { %s572_s15 = sadd.s32 4294967295, %s1005_s14   ;;  %s573_s16 = sadd.s32 4294967294, %s1005_s14   ;;  %s1005_s14 = sphi %s1039_s14, %s19_s14   ;;  %s1001_s13 = sphi %s1037_s13, %s1254_s13   ;;  %s997_s12 = sphi %s1035_s12, %s1253_s12   ;;  %s993_s11 = sphi %s1033_s11, %s1252_s11   ;;  %s989_s10 = sphi %s1031_s10, %s1251_s10   ;;  %s985_s9 = sphi %s1029_s9, %s1250_s9  }
   0x8   : > { %p77_p0 = scmp.ne.s32.totalorder %s989_s10, %s985_s9  ;;  %p1063_p1 = scmp.eq.s32.totalorder %s572_s15, 0 }
   0x9   : > { %p1067_p2 = scmp.eq.s32.totalorder %s572_s15, 3  ;;  %p109_p3 = scmp.eq.s32.totalorder %s573_s16, 3 }
   0xa   : > { %p1073_p4 = por %p1063_p1, %p77_p0  ;;  %p574_p5 = scmp.ge.s32.totalorder %s1005_s14, 1 }
   0xb   : > { %p1078_p6 = por %p109_p3, %p77_p0  ;;  %p116_p7 = scmp.lt.s32.totalorder %s1005_s14, 5 }
   0xc   : > { %s1007_s22 = smov [#allocation2]   ;;  %s28_s25 = sadd.s32 1, %s1001_s13 }
   0xd   : > { %s1241_s20 = scalar_select %p1078_p6, 1, 0 }
   0xe   : > { %p1083_p8 = pnand %p574_p5, %p116_p7  ;;  %s131_s23 = sshll.u32 %s1007_s22, 4  ;;  %s132_s23 = int_to_ptr.vmem [resolvable:$true] %s131_s23 }
   0xf   : > { %s878_s26 = scalar_lea.vmem %s132_s23, 2048  ;;  %p886_p3 = scmp.lt.s32.totalorder %s132_s23, %s132_s23 }
  0x10   : > { %p798_p9 = pneg %p1083_p8  ;;  %p879_p12 = scmp.ne.s32.totalorder %s132_s23, %s878_s26 }
  0x11   : > { %p887_p5 = scmp.lt.s32.totalorder %s878_s26, %s878_s26 }
  0x12   : > { %p1091_p10 = pnand %p798_p9, %p1063_p1 }
  0x13   : > { %p888_p7 = por %p887_p5, %p886_p3 }
  0x14   : > { %p869_p11 = pneg %p1091_p10 }
  0x16   : > { %p881_p13 = pnand %p879_p12, %p869_p11 }
  0x18   : > { %p882_p0 = pneg %p881_p13 }
  0x1a   : > { %p889_p6 = pnand %p888_p7, %p882_p0 }
  0x1c   : > { %892 = shalt.err (!%p889_p6)
}
  0x1d   : > { %s1236_s27 = smov 128   ;;  %s1009_s28 = smov 8  }
  0x1e   : > { %801 = dma.hbm_to_vmem [thread:$0]  (!%p1091_p10), %s1233_s0, 2048, %s132_s23, [#allocation3], %s1236_s27, %s1236_s27, %s1009_s28  }
  0x1f   : > { %p29_p6 = scmp.ge.s32.totalorder %s28_s25, 4  ;;  %s64_s3 = sadd.s32 1, %s993_s11 }
  0x20   : > { %p71_p9 = scmp.ne.s32.totalorder %s993_s11, %s989_s10  ;;  %p72_p11 = scmp.eq.s32.totalorder %s1005_s14, 0 }
  0x21   : > { %s1256_s25 = smov (%p29_p6, %s28_s25), 0  ;;  %p811_p0 = scmp.lt.s32.totalorder %s1005_s14, 4 }
  0x22   : > { %p1112_p12 = por %p72_p11, %p71_p9  ;;  %p1118_p13 = por %p1067_p2, %p71_p9 }
  0x23   : > { %s61_s6 = ssub.s32 %s1001_s13, %s1256_s25  ;;  %s145_s7 = sand.u32 1, %s993_s11  }
  0x24   : > { %s1245_s5 = scalar_select %p1118_p13, 1, 0 }
  0x25   : > { %p62_p10 = scmp.eq.s32.totalorder %s61_s6, 0  ;;  %s577_s8 = sshll.u32 %s145_s7, 7 }
  0x26   : > { %s605_s16 = sshll.u32 %s1001_s13, 11  ;;  %s149_s26 = scalar_lea.vmem [#allocation5], %s577_s8 }
  0x27   : > { %s1127_s15 = scalar_select %p62_p10, %s993_s11, %s64_s3  }
  0x28   : > { %s155_s24 = scalar_lea.hbm %s1234_s1, %s605_s16  ;;  %s156_s29 = sshll.u32 %s149_s26, 4  ;;  %s157_s29 = int_to_ptr.vmem [resolvable:$true] %s156_s29 }
  0x29   : > { %p1135_p2 = pnand %p811_p0, %p1112_p12  ;;  %s146_s30 = scalar_lea.sflag [#allocation6], %s145_s7 }
  0x2a   : > { %s906_s6 = scalar_lea.vmem %s157_s29, 2048  ;;  %s1010_s3 = smov [#allocation5]  }
  0x2b   : > { %p895_p3 = pneg %p1135_p2  ;;  %p907_p5 = scmp.ne.s32.totalorder %s157_s29, %s906_s6 }
  0x2c   : > { %s911_s27 = sshll.u32 %s1010_s3, 4  ;;  %s912_s27 = int_to_ptr.vmem [resolvable:$false] %s911_s27 }
  0x2d   : > { %p909_p7 = pnand %p907_p5, %p895_p3  ;;  %s913_s16 = scalar_lea.vmem %s912_s27, 4096 }
  0x2e   : > { %p914_p9 = scmp.lt.s32.totalorder %s157_s29, %s912_s27  ;;  %p915_p11 = scmp.lt.s32.totalorder %s913_s16, %s906_s6 }
  0x2f   : > { %p910_p6 = pneg %p909_p7 }
  0x30   : > { %p916_p10 = por %p915_p11, %p914_p9 }
  0x32   : > { %p917_p13 = pnand %p916_p10, %p910_p6 }
  0x34   : > { %920 = shalt.err (!%p917_p13)
}
  0x35   : > { %s1247_s4 = smov 128   ;;  %168 = sbr.rel (%p1083_p8) target bundleno = 320 (0x140), region = 28 }
  0x36   : > { %805 = dma.hbm_to_vmem [thread:$0]  (!%p1135_p2), %s155_s24, 2048, %s157_s29, %s146_s30, %s1247_s4, %s1247_s4, %s1009_s28  }
  0x3a   : > { %972 = dma.done.wait (%p1063_p1), [#allocation3], 2048  }
  0x3b   : > { %974 = vsyncadd (%p1063_p1), [#allocation3], 4294965248  ;;  %s1153_s27 = sand.u32 1, %s989_s10  }
  0x3c   : > { %s582_s7 = sshll.u32 %s1153_s27, 7  ;;  %s175_s8 = scalar_lea.sflag [#allocation6], %s1153_s27 }
  0x3d   : > { %s1157_s22 = scalar_lea.vmem [#allocation5], %s582_s7 }
  0x3e   : > { %976 = dma.done.wait (%p1073_p4), %s175_s8, 2048  }
  0x3f   : > { %978 = vsyncadd (%p1073_p4), %s175_s8, 4294965248  ;;  %v232_v0 = vld [vmem:[%s1157_s22 + $0x78] sm:$0xff]  ;;  %v231_v1 = vld [vmem:[%s1157_s22 + $0x70] sm:$0xff]  ;;  %s583_s17 = sshll.u32 %s1153_s27, 6  ;;  %s622_s28 = sshll.u32 %s997_s12, 10 }
  0x40   : > { %702 = vmatprep.subr.mxu0 %v232_v0  ;;  %758 = vmatprep.subr.mxu1 %v232_v0  ;;  %v230_v2 = vld [vmem:[%s1157_s22 + $0x68] sm:$0xff]  ;;  %v229_v3 = vld [vmem:[%s1157_s22 + $0x60] sm:$0xff]  ;;  %v228_v4 = vld [vmem:[%s1157_s22 + $0x58] sm:$0xff]  ;;  %s198_s19 = scalar_lea.vmem [#allocation7], %s583_s17  ;;  %s1186_s26 = scalar_lea.hbm %s1235_s2, %s622_s28 }
  0x41   : > { %703 = vmatpush3.msra.mxu0 %v232_v0  ;;  %774 = vmatpush3.msra.mxu1 %v232_v0  ;;  %v227_v5 = vld [vmem:[%s1157_s22 + $0x50] sm:$0xff]  ;;  %v226_v6 = vld [vmem:[%s1157_s22 + $0x48] sm:$0xff]  ;;  %v225_v7 = vld [vmem:[%s1157_s22 + $0x40] sm:$0xff]  ;;  %s474_s21 = sshll.u32 %s198_s19, 4  ;;  %s459_s12 = scalar_lea.sflag [#allocation4], %s1153_s27  ;;  %s1181_s21 = int_to_ptr.vmem [resolvable:$true] %s474_s21 }
  0x42   : > { %704 = vmatprep.subr.mxu0 %v231_v1  ;;  %759 = vmatprep.subr.mxu1 %v231_v1  ;;  %v224_v8 = vld [vmem:[%s1157_s22 + $0x38] sm:$0xff]  ;;  %v223_v9 = vld [vmem:[%s1157_s22 + $0x30] sm:$0xff]  ;;  %v222_v10 = vld [vmem:[%s1157_s22 + $0x28] sm:$0xff]  ;;  %s921_s29 = scalar_lea.vmem %s1181_s21, 1024  ;;  %p1248_p4 = scmp.ne.s32.totalorder %s1245_s5, 0 }
  0x43   : > { %705 = vmatpush3.msra.mxu0 %v231_v1  ;;  %775 = vmatpush3.msra.mxu1 %v231_v1  ;;  %v221_v11 = vld [vmem:[%s1157_s22 + $0x20] sm:$0xff]  ;;  %v220_v12 = vld [vmem:[%s1157_s22 + $0x18] sm:$0xff]  ;;  %v219_v13 = vld [vmem:[%s1157_s22 + $0x10] sm:$0xff]  ;;  %p922_p1 = scmp.ne.s32.totalorder %s1181_s21, %s921_s29  ;;  %s1011_s18 = smov [#allocation7]  }
  0x44   : > { %706 = vmatprep.subr.mxu0 %v230_v2  ;;  %760 = vmatprep.subr.mxu1 %v230_v2  ;;  %v218_v14 = vld [vmem:[%s1157_s22 + $0x8] sm:$0xff]  ;;  %v217_v15 = vld [vmem:[%s1157_s22] sm:$0xff]  ;;  %v203_v20 = vld [vmem:[#allocation2 + $0x10] sm:$0xff]  ;;  %s925_s30 = sshll.u32 %s1011_s18, 4  ;;  %s926_s30 = int_to_ptr.vmem [resolvable:$false] %s925_s30 }
  0x45   : > { %707 = vmatpush3.msra.mxu0 %v230_v2  ;;  %776 = vmatpush3.msra.mxu1 %v230_v2  ;;  %v201_v16 = vld [vmem:[#allocation2] sm:$0xff]  ;;  %v202_v18 = vld [vmem:[#allocation2 + $0x8] sm:$0xff]  ;;  %v211_v21 = vld [vmem:[#allocation2 + $0x50] sm:$0xff]  ;;  %p923_p8 = pnand %p922_p1, %p1248_p4  ;;  %s927_s6 = scalar_lea.vmem %s926_s30, 2048 }
  0x46   : > { %708 = vmatprep.subr.mxu0 %v229_v3  ;;  %761 = vmatprep.subr.mxu1 %v229_v3  ;;  %v209_v17 = vld [vmem:[#allocation2 + $0x40] sm:$0xff]  ;;  %v210_v19 = vld [vmem:[#allocation2 + $0x48] sm:$0xff]  ;;  %v204_v22 = vld [vmem:[#allocation2 + $0x18] sm:$0xff]  ;;  %p928_p13 = scmp.lt.s32.totalorder %s1181_s21, %s926_s30  ;;  %p929_p0 = scmp.lt.s32.totalorder %s927_s6, %s921_s29 }
  0x47   : > { %709 = vmatpush3.msra.mxu0 %v229_v3  ;;  %777 = vmatpush3.msra.mxu1 %v229_v3  ;;  %v212_v23 = vld [vmem:[#allocation2 + $0x58] sm:$0xff]  ;;  %v205_v24 = vld [vmem:[#allocation2 + $0x20] sm:$0xff]  ;;  %v206_v26 = vld [vmem:[#allocation2 + $0x28] sm:$0xff]  ;;  %p924_p12 = pneg %p923_p8 }
  0x48   : > { %710 = vmatprep.subr.mxu0 %v228_v4  ;;  %762 = vmatprep.subr.mxu1 %v228_v4  ;;  %v213_v25 = vld [vmem:[#allocation2 + $0x60] sm:$0xff]  ;;  %v214_v27 = vld [vmem:[#allocation2 + $0x68] sm:$0xff]  ;;  %v207_v28 = vld [vmem:[#allocation2 + $0x30] sm:$0xff]  ;;  %p930_p2 = por %p929_p0, %p928_p13 }
  0x49   : > { %711 = vmatpush3.msra.mxu0 %v228_v4  ;;  %778 = vmatpush3.msra.mxu1 %v228_v4  ;;  %v215_v29 = vld [vmem:[#allocation2 + $0x70] sm:$0xff]  ;;  %v208_v30 = vld [vmem:[#allocation2 + $0x38] sm:$0xff] }
  0x4a   : > { %712 = vmatprep.subr.mxu0 %v227_v5  ;;  %763 = vmatprep.subr.mxu1 %v227_v5  ;;  %v216_v31 = vld [vmem:[#allocation2 + $0x78] sm:$0xff]  ;;  %p931_p3 = pnand %p930_p2, %p924_p12 }
  0x4b   : > { %713 = vmatpush3.msra.mxu0 %v227_v5  ;;  %779 = vmatpush3.msra.mxu1 %v227_v5 }
  0x4c   : > { %714 = vmatprep.subr.mxu0 %v226_v6  ;;  %764 = vmatprep.subr.mxu1 %v226_v6 }
  0x4d   : > { %715 = vmatpush3.msra.mxu0 %v226_v6  ;;  %780 = vmatpush3.msra.mxu1 %v226_v6 }
  0x4e   : > { %716 = vmatprep.subr.mxu0 %v225_v7  ;;  %765 = vmatprep.subr.mxu1 %v225_v7 }
  0x4f   : > { %717 = vmatpush3.msra.mxu0 %v225_v7  ;;  %781 = vmatpush3.msra.mxu1 %v225_v7 }
  0x50   : > { %718 = vmatprep.subr.mxu0 %v224_v8  ;;  %766 = vmatprep.subr.mxu1 %v224_v8 }
  0x51   : > { %719 = vmatpush3.msra.mxu0 %v224_v8  ;;  %782 = vmatpush3.msra.mxu1 %v224_v8 }
  0x52   : > { %720 = vmatprep.subr.mxu0 %v223_v9  ;;  %767 = vmatprep.subr.mxu1 %v223_v9 }
  0x53   : > { %721 = vmatpush3.msra.mxu0 %v223_v9  ;;  %783 = vmatpush3.msra.mxu1 %v223_v9 }
  0x54   : > { %722 = vmatprep.subr.mxu0 %v222_v10  ;;  %768 = vmatprep.subr.mxu1 %v222_v10 }
  0x55   : > { %723 = vmatpush3.msra.mxu0 %v222_v10  ;;  %784 = vmatpush3.msra.mxu1 %v222_v10 }
  0x56   : > { %724 = vmatprep.subr.mxu0 %v221_v11  ;;  %769 = vmatprep.subr.mxu1 %v221_v11 }
  0x57   : > { %725 = vmatpush3.msra.mxu0 %v221_v11  ;;  %785 = vmatpush3.msra.mxu1 %v221_v11 }
  0x58   : > { %726 = vmatprep.subr.mxu0 %v220_v12  ;;  %770 = vmatprep.subr.mxu1 %v220_v12 }
  0x59   : > { %727 = vmatpush3.msra.mxu0 %v220_v12  ;;  %786 = vmatpush3.msra.mxu1 %v220_v12 }
  0x5a   : > { %728 = vmatprep.subr.mxu0 %v219_v13  ;;  %771 = vmatprep.subr.mxu1 %v219_v13 }
  0x5b   : > { %729 = vmatpush3.msra.mxu0 %v219_v13  ;;  %787 = vmatpush3.msra.mxu1 %v219_v13 }
  0x5c   : > { %730 = vmatprep.subr.mxu0 %v218_v14  ;;  %772 = vmatprep.subr.mxu1 %v218_v14 }
  0x5d   : > { %731 = vmatpush3.msra.mxu0 %v218_v14  ;;  %788 = vmatpush3.msra.mxu1 %v218_v14 }
  0x5e   : > { %732 = vmatprep.subr.mxu0 %v217_v15  ;;  %773 = vmatprep.subr.mxu1 %v217_v15 }
  0x5f   : > { %733 = vmatpush3.msra.mxu0 %v217_v15  ;;  %789 = vmatpush3.msra.mxu1 %v217_v15 }
  0x60   : > { %734 = vmatprep.mubr.f32.mxu0 %v201_v16  ;;  %746 = vmatprep.mubr.f32.mxu1 %v209_v17 }
  0x61   : > { %735 = vmatmul.mubr.f32.vlgmr.msra.gmra.mxu0 %v202_v18  ;;  %747 = vmatmul.mubr.f32.vlgmr.msra.gmra.mxu1 %v210_v19 }
  0x62   : > { %737 = vmatprep.mubr.f32.mxu0 %v203_v20  ;;  %749 = vmatprep.mubr.f32.mxu1 %v211_v21 }
  0x65   : > { %738 = vmatmul.mubr.f32.gmra.mxu0 %v204_v22  ;;  %750 = vmatmul.mubr.f32.gmra.mxu1 %v212_v23 }
  0x66   : > { %740 = vmatprep.mubr.f32.mxu0 %v205_v24  ;;  %752 = vmatprep.mubr.f32.mxu1 %v213_v25 }
  0x69   : > { %741 = vmatmul.mubr.f32.gmra.mxu0 %v206_v26  ;;  %753 = vmatmul.mubr.f32.gmra.mxu1 %v214_v27 }
  0x6a   : > { %743 = vmatprep.mubr.f32.mxu0 %v207_v28  ;;  %755 = vmatprep.mubr.f32.mxu1 %v215_v29 }
  0x6d   : > { %744 = vmatmul.mubr.f32.gmra.mxu0 %v208_v30  ;;  %756 = vmatmul.mubr.f32.gmra.mxu1 %v216_v31 }
 0x121   : > { %v736_v32 = vpop.f32.mrf.mxu0  ;;  %v748_v33 = vpop.f32.mrf.mxu1 }
 0x123   : > { %v299_v34 = vpop.f32.mrf.mxu0  ;;  %v339_v35 = vpop.f32.mrf.mxu1 }
 0x124   : > { %v626_v36 = vpack.c.bf16 %v736_v32, %v299_v34  ;;  %v646_v37 = vpack.c.bf16 %v748_v33, %v339_v35 }
 0x125   : > { %v739_v38 = vpop.f32.mrf.mxu0  ;;  %v751_v39 = vpop.f32.mrf.mxu1 }
 0x126   : > { %627 = vst [vmem:[%s198_s19] sm:$0xff] %v626_v36   ;;  %666 = vst [vmem:[%s198_s19 + $0x20] sm:$0xff] %v646_v37  }
 0x127   : > { %v309_v40 = vpop.f32.mrf.mxu0  ;;  %v349_v41 = vpop.f32.mrf.mxu1 }
 0x128   : > { %v631_v42 = vpack.c.bf16 %v739_v38, %v309_v40  ;;  %v651_v43 = vpack.c.bf16 %v751_v39, %v349_v41 }
 0x129   : > { %v742_v44 = vpop.f32.mrf.mxu0  ;;  %v754_v45 = vpop.f32.mrf.mxu1 }
 0x12a   : > { %663 = vst [vmem:[%s198_s19 + $0x8] sm:$0xff] %v631_v42   ;;  %667 = vst [vmem:[%s198_s19 + $0x28] sm:$0xff] %v651_v43  }
 0x12b   : > { %v319_v46 = vpop.f32.mrf.mxu0  ;;  %v359_v47 = vpop.f32.mrf.mxu1 }
 0x12c   : > { %v636_v48 = vpack.c.bf16 %v742_v44, %v319_v46  ;;  %v656_v49 = vpack.c.bf16 %v754_v45, %v359_v47 }
 0x12d   : > { %v745_v50 = vpop.f32.mrf.mxu0  ;;  %v757_v51 = vpop.f32.mrf.mxu1 }
 0x12e   : > { %664 = vst [vmem:[%s198_s19 + $0x10] sm:$0xff] %v636_v48   ;;  %668 = vst [vmem:[%s198_s19 + $0x30] sm:$0xff] %v656_v49  }
 0x12f   : > { %v329_v52 = vpop.f32.mrf.mxu0  ;;  %v369_v53 = vpop.f32.mrf.mxu1 }
 0x130   : > { %v641_v54 = vpack.c.bf16 %v745_v50, %v329_v52  ;;  %v661_v55 = vpack.c.bf16 %v757_v51, %v369_v53 }
 0x132   : > { %665 = vst [vmem:[%s198_s19 + $0x18] sm:$0xff] %v641_v54   ;;  %669 = vst [vmem:[%s198_s19 + $0x38] sm:$0xff] %v661_v55  }
 0x133   : > { %934 = shalt.err (!%p931_p3)
}
 0x134   : > { %s935_s3 = scalar_lea.hbm %s1186_s26, 1024  ;;  %s939_s7 = scalar_lea.hbm %s1235_s2, 4096 }
 0x135   : > { %p936_p5 = scmp.ne.s32.totalorder %s1186_s26, %s935_s3  ;;  %p940_p9 = scmp.lt.s32.totalorder %s1186_s26, %s1235_s2 }
 0x136   : > { %p941_p11 = scmp.lt.s32.totalorder %s939_s7, %s935_s3 }
 0x137   : > { %p937_p7 = pnand %p936_p5, %p1248_p4 }
 0x138   : > { %p942_p10 = por %p941_p11, %p940_p9 }
 0x139   : > { %p938_p6 = pneg %p937_p7 }
 0x13b   : > { %p943_p1 = pnand %p942_p10, %p938_p6 }
 0x13d   : > { %946 = shalt.err (!%p943_p1)
}
 0x13e   : > { %s1012_s17 = smov 64   ;;  %s1013_s19 = smov 4  }
 0x13f   : > { %796 = dma.vmem_to_hbm [thread:$0]  (%p1248_p4), %s1181_s21, 1024, %s1186_s26, %s459_s12, %s1012_s17, %s1012_s17, %s1013_s19  }
 0x140 PF: > { %p813_p8 = scmp.ge.s32.totalorder %s1005_s14, 2  ;;  %s489_s28 = sand.u32 1, %s985_s9  }
 0x141   : > { %p1249_p12 = scmp.ne.s32.totalorder %s1241_s20, 0  ;;  %s490_s23 = scalar_lea.sflag [#allocation4], %s489_s28 }
 0x143   : > { %p807_p13 = pnand %p813_p8, %p1249_p12 }
 0x145   : > { %p808_p0 = pneg %p807_p13 }
 0x147   : > { %980 = dma.done.wait (%p808_p0), %s490_s23, 1024  }
 0x148   : > { %982 = vsyncadd (%p808_p0), %s490_s23, 4294966272  ;;  %s19_s14 = sadd.s32 1, %s1005_s14   ;;  %s1250_s9 = smov %s989_s10 }
 0x149   : > { %p16_p2 = scmp.ge.s32.totalorder %s19_s14, 6   ;;  %s1251_s10 = smov %s993_s11 }
 0x14a   : > { %s1252_s11 = smov %s1127_s15  ;;  %s1253_s12 = smov %s1001_s13 }
 0x14b   : > { %s1254_s13 = smov %s1256_s25  ;;  %18 = sbr.rel (!%p16_p2) target bundleno = 7 (0x7), region = 79 }
 0x150   :  { %495 = vsyncpa [#allocation3], 1 }
 0x151   :  { %497 = vsyncpa [#allocation3 + $0x1], 1 }
 0x152   :  { %498 = vsyncpa [#allocation6], 1 }
 0x153   :  { %500 = vsyncpa [#allocation6 + $0x1], 1 }
 0x154   :  { %501 = vsyncpa [#allocation4], 1 }
 0x155   :  { %503 = vsyncpa [#allocation4 + $0x1], 1 }

</bundles_post_ra>
